<compile_context>
chip_gen: v7x
topology: tpu7x:2x2x1
jax: 0.10.0
libtpu: 0.0.40
codegen_flags: <defaults>
</compile_context>

<pallas_src>
import functools

import jax
import jax.numpy as jnp
from jax.experimental import pallas as pl
from jax.experimental.pallas import tpu as pltpu


def _contrastive_loss_kernel(diag_col_ref, diag_row_ref, scores_ref,
                             out_ref, acc_ref, colmax_ref,
                             *, margin, max_violation, tm):
    i = pl.program_id(0)
    n_blocks = pl.num_programs(0)

    @pl.when(i == 0)
    def _init():
        acc_ref[...] = jnp.zeros_like(acc_ref)
        colmax_ref[...] = jnp.zeros_like(colmax_ref)

    s = scores_ref[...].astype(jnp.float32)        # (TM, N)
    d1 = diag_col_ref[...]                         # (TM, 1) f32: diag for these rows
    d2 = diag_row_ref[...]                         # (1,  N) f32: full diag as a row

    cost_s = jnp.maximum(margin + s - d1, 0.0)     # (TM, N)
    cost_im = jnp.maximum(margin + s - d2, 0.0)    # (TM, N)

    if max_violation:
        # Diagonal must be zeroed before the max reductions (matches PyTorch
        # masked_fill_ with 0; all costs are >= 0 so 0 is the neutral element).
        rows = jax.lax.broadcasted_iota(jnp.int32, s.shape, 0) + i * tm
        cols = jax.lax.broadcasted_iota(jnp.int32, s.shape, 1)
        off_diag = rows != cols
        cost_s = jnp.where(off_diag, cost_s, 0.0)
        cost_im = jnp.where(off_diag, cost_im, 0.0)

        row_max = jnp.max(cost_s, axis=1, keepdims=True)            # (TM, 1)
        acc_ref[...] += jnp.sum(row_max, axis=0, keepdims=True)     # (1, 1)
        colmax_ref[...] = jnp.maximum(
            colmax_ref[...], jnp.max(cost_im, axis=0, keepdims=True))  # (1, N)
    else:
        # No diagonal masking here: each diagonal entry contributes exactly
        # max(margin, 0) to both cost_s and cost_im; the wrapper subtracts
        # 2 * N * max(margin, 0) from the final sum (exact for any margin).
        total = cost_s + cost_im
        acc_ref[...] += jnp.sum(
            jnp.sum(total, axis=1, keepdims=True), axis=0, keepdims=True)

    @pl.when(i == n_blocks - 1)
    def _finalize():
        if max_violation:
            out_ref[...] = acc_ref[...] + jnp.sum(
                colmax_ref[...], axis=1, keepdims=True)
        else:
            out_ref[...] = acc_ref[...]


def _pick_tm(n, dtype):
    """Row-block size: lane dim stays full N, tile only the sublane dim."""
    sub = 16 if jnp.dtype(dtype) == jnp.dtype(jnp.bfloat16) else 8
    itemsize = jnp.dtype(dtype).itemsize
    if n % sub != 0:
        return n  # single full block (block shape == array shape is allowed)
    # Keep one in-flight input buffer <= ~4 MiB so double buffering fits
    # comfortably under the scoped VMEM defaults on v5e/v6e/v7x.
    budget_rows = max(sub, (4 * 1024 * 1024) // max(1, n * itemsize))
    for tm in (1024, 512, 256, 128, 64, 32, 16, 8):
        if tm <= min(n, budget_rows) and n % tm == 0 and tm % sub == 0:
            return tm
    return n


def contrastive_loss(scores, margin=0.0, max_violation=False, block_rows=None):
    """Pallas wrapper: scores [N, N] (f32 or bf16) -> scalar float32 loss."""
    n = scores.shape[0]
    assert scores.shape == (n, n), "forward_ expects a square score matrix"
    margin = float(margin)

    # Hoist the diagonal out of the kernel (tiny XLA gather).
    diag = jnp.diagonal(scores).astype(jnp.float32)
    diag_col = diag.reshape(n, 1)
    diag_row = diag.reshape(1, n)

    sub = 16 if jnp.dtype(scores.dtype) == jnp.dtype(jnp.bfloat16) else 8
    if (block_rows is not None and n % block_rows == 0
            and (block_rows % sub == 0 or block_rows == n)):
        tm = int(block_rows)
    else:
        tm = _pick_tm(n, scores.dtype)
    grid = (n // tm,)

    kernel = functools.partial(
        _contrastive_loss_kernel,
        margin=margin,
        max_violation=bool(max_violation),
        tm=tm,
    )

    itemsize = jnp.dtype(scores.dtype).itemsize
    out = pl.pallas_call(
        kernel,
        out_shape=jax.ShapeDtypeStruct((1, 1), jnp.float32),
        grid_spec=pltpu.PrefetchScalarGridSpec(
            num_scalar_prefetch=0,
            grid=grid,
            in_specs=[
                pl.BlockSpec((tm, 1), lambda i: (i, 0)),   # diag column slice
                pl.BlockSpec((1, n), lambda i: (0, 0)),    # diag row (broadcast)
                pl.BlockSpec((tm, n), lambda i: (i, 0)),   # scores row block
            ],
            out_specs=pl.BlockSpec((1, 1), lambda i: (0, 0)),
            scratch_shapes=[
                pltpu.VMEM((1, 1), jnp.float32),           # running scalar sum
                pltpu.VMEM((1, n), jnp.float32),           # running column max
            ],
        ),
        compiler_params=pltpu.CompilerParams(
            # Reduction over row blocks into a resident accumulator.
            # TODO(synk): per-block partial outputs + "parallel" would let the
            # two v7x TensorCores split the rows; kept "arbitrary" for a single
            # exact accumulator.
            dimension_semantics=("arbitrary",)),
        cost_estimate=pl.CostEstimate(
            flops=6 * n * n,
            transcendentals=0,
            bytes_accessed=n * n * itemsize + 2 * n * 4 + 4),
    )(diag_col, diag_row, scores)

    loss = out[0, 0]
    if not max_violation:
        # Exact correction for the unmasked diagonal entries (see kernel).
        loss = loss - jnp.float32(2.0 * n * max(margin, 0.0))
    return loss


def _contrastive_loss_ref(scores, margin=0.0, max_violation=False):
    """Pure-JAX reference mirroring the PyTorch forward_ exactly."""
    scores = scores.astype(jnp.float32)
    n = scores.shape[0]
    diag = jnp.diagonal(scores).reshape(n, 1)
    cost_s = jnp.maximum(margin + scores - diag, 0.0)
    cost_im = jnp.maximum(margin + scores - diag.T, 0.0)
    eye = jnp.eye(n, dtype=bool)
    cost_s = jnp.where(eye, 0.0, cost_s)
    cost_im = jnp.where(eye, 0.0, cost_im)
    if max_violation:
        cost_s = jnp.max(cost_s, axis=1)
        cost_im = jnp.max(cost_im, axis=0)
    return jnp.sum(cost_s) + jnp.sum(cost_im)


if __name__ == "__main__":
    key = jax.random.PRNGKey(0)
    N = 128  # batch of (image, sentence) pairs -> [N, N] similarity matrix
    scores = jax.random.normal(key, (N, N), dtype=jnp.float32)

    # 1) Module defaults: margin=0, max_violation=False (multi row-block grid).
    loss = contrastive_loss(scores, margin=0.0, max_violation=False,
                            block_rows=32)
    jax.block_until_ready(loss)
    ref = _contrastive_loss_ref(scores, margin=0.0, max_violation=False)
    assert jnp.allclose(loss, ref, rtol=1e-5, atol=1e-4), (loss, ref)

    # 2) Sum path with nonzero margin (exercises the diagonal correction).
    loss_m = contrastive_loss(scores, margin=0.2, max_violation=False,
                              block_rows=32)
    jax.block_until_ready(loss_m)
    ref_m = _contrastive_loss_ref(scores, margin=0.2, max_violation=False)
    assert jnp.allclose(loss_m, ref_m, rtol=1e-5, atol=1e-3), (loss_m, ref_m)

    # 3) max_violation path (running column-max carried across row blocks).
    loss_mv = contrastive_loss(scores, margin=0.2, max_violation=True,
                               block_rows=32)
    jax.block_until_ready(loss_mv)
    ref_mv = _contrastive_loss_ref(scores, margin=0.2, max_violation=True)
    assert jnp.allclose(loss_mv, ref_mv, rtol=1e-5, atol=1e-4), (loss_mv, ref_mv)

    # 4) bf16 input path: no wrapper pre-cast, kernel upcasts each tile to f32.
    scores_bf16 = scores.astype(jnp.bfloat16)
    loss_bf = contrastive_loss(scores_bf16, margin=0.0, max_violation=False)
    jax.block_until_ready(loss_bf)
    ref_bf = _contrastive_loss_ref(scores_bf16.astype(jnp.float32),
                                   margin=0.0, max_violation=False)
    assert jnp.allclose(loss_bf, ref_bf, rtol=2e-2, atol=2e-1), (loss_bf, ref_bf)

    print("KERNEL_OK")
</pallas_src>

<mosaic_0001>
module attributes {stable_mosaic.version = 11 : i64} {
  func.func @_contrastive_loss_kernel(%arg0: i32, %arg1: memref<32x1xf32, #tpu.memory_space<vmem>>, %arg2: memref<1x128xf32, #tpu.memory_space<vmem>>, %arg3: memref<32x128xf32, #tpu.memory_space<vmem>>, %arg4: memref<1x1xf32, #tpu.memory_space<vmem>>, %arg5: memref<1x1xf32, #tpu.memory_space<vmem>>, %arg6: memref<1x128xf32, #tpu.memory_space<vmem>>) attributes {dimension_semantics = [#tpu.dimension_semantics<arbitrary>], iteration_bounds = array<i64: 4>, scalar_prefetch = 0 : i64, scratch_operands = 2 : i64, tpu.core_type = #tpu.core_type<tc>, window_params = [{transform_indices = @transform_0, window_bounds = array<i64: 32, 1>}, {pipeline_mode = #tpu.pipeline_mode<synchronous>, transform_indices = @transform_1, window_bounds = array<i64: 1, 128>}, {transform_indices = @transform_2, window_bounds = array<i64: 32, 128>}, {pipeline_mode = #tpu.pipeline_mode<synchronous>, transform_indices = @transform_3, window_bounds = array<i64: 1, 1>}]} {
    %c0_i32 = arith.constant 0 : i32
    %0 = arith.cmpi eq, %arg0, %c0_i32 : i32
    %1 = arith.extui %0 : i1 to i32
    %c0_i32_0 = arith.constant 0 : i32
    %2 = arith.cmpi ne, %1, %c0_i32_0 : i32
    scf.if %2 {
      %cst_16 = arith.constant 0.000000e+00 : f32
      %29 = vector.broadcast %cst_16 : f32 to vector<1x1xf32>
      %c0_17 = arith.constant 0 : index
      %c0_18 = arith.constant 0 : index
      %30 = vector.load %arg5[%c0_17, %c0_18] : memref<1x1xf32, #tpu.memory_space<vmem>>, vector<1x1xf32>
      tpu.vector_store %arg5[%c0_17, %c0_18], %29 {strides = array<i32>} : memref<1x1xf32, #tpu.memory_space<vmem>>, vector<1x1xf32>,
      %cst_19 = arith.constant 0.000000e+00 : f32
      %31 = vector.broadcast %cst_19 : f32 to vector<1x128xf32>
      %c0_20 = arith.constant 0 : index
      %c0_21 = arith.constant 0 : index
      %32 = vector.load %arg6[%c0_20, %c0_21] : memref<1x128xf32, #tpu.memory_space<vmem>>, vector<1x128xf32>
      tpu.vector_store %arg6[%c0_20, %c0_21], %31 {strides = array<i32>} : memref<1x128xf32, #tpu.memory_space<vmem>>, vector<1x128xf32>,
    } else {
    }
    %c0 = arith.constant 0 : index
    %c0_1 = arith.constant 0 : index
    %3 = vector.load %arg3[%c0, %c0_1] : memref<32x128xf32, #tpu.memory_space<vmem>>, vector<32x128xf32>
    %c0_2 = arith.constant 0 : index
    %c0_3 = arith.constant 0 : index
    %4 = vector.load %arg1[%c0_2, %c0_3] : memref<32x1xf32, #tpu.memory_space<vmem>>, vector<32x1xf32>
    %c0_4 = arith.constant 0 : index
    %c0_5 = arith.constant 0 : index
    %5 = vector.load %arg2[%c0_4, %c0_5] : memref<1x128xf32, #tpu.memory_space<vmem>>, vector<1x128xf32>
    %cst = arith.constant 0.000000e+00 : f32
    %6 = vector.broadcast %cst : f32 to vector<32x128xf32>
    %7 = arith.addf %6, %3 : vector<32x128xf32>
    %8 = vector.broadcast %4 : vector<32x1xf32> to vector<32x128xf32>
    %9 = arith.subf %7, %8 : vector<32x128xf32>
    %cst_6 = arith.constant 0.000000e+00 : f32
    %10 = vector.broadcast %cst_6 : f32 to vector<32x128xf32>
    %11 = arith.maximumf %9, %10 : vector<32x128xf32>
    %cst_7 = arith.constant 0.000000e+00 : f32
    %12 = vector.broadcast %cst_7 : f32 to vector<32x128xf32>
    %13 = arith.addf %12, %3 : vector<32x128xf32>
    %14 = vector.broadcast %5 : vector<1x128xf32> to vector<32x128xf32>
    %15 = arith.subf %13, %14 : vector<32x128xf32>
    %cst_8 = arith.constant 0.000000e+00 : f32
    %16 = vector.broadcast %cst_8 : f32 to vector<32x128xf32>
    %17 = arith.maximumf %15, %16 : vector<32x128xf32>
    %18 = arith.addf %11, %17 : vector<32x128xf32>
    %c0_9 = arith.constant 0 : index
    %c0_10 = arith.constant 0 : index
    %19 = vector.load %arg5[%c0_9, %c0_10] : memref<1x1xf32, #tpu.memory_space<vmem>>, vector<1x1xf32>
    %cst_11 = arith.constant dense<0.000000e+00> : vector<32xf32>
    %20 = vector.multi_reduction <add>, %18, %cst_11 [1] : vector<32x128xf32> to vector<32xf32>
    %21 = vector.shape_cast %20 : vector<32xf32> to vector<32x1xf32>
    %cst_12 = arith.constant dense<0.000000e+00> : vector<1xf32>
    %22 = vector.multi_reduction <add>, %21, %cst_12 [0] : vector<32x1xf32> to vector<1xf32>
    %23 = vector.shape_cast %22 : vector<1xf32> to vector<1x1xf32>
    %24 = arith.addf %19, %23 : vector<1x1xf32>
    %c0_13 = arith.constant 0 : index
    %c0_14 = arith.constant 0 : index
    %25 = vector.load %arg5[%c0_13, %c0_14] : memref<1x1xf32, #tpu.memory_space<vmem>>, vector<1x1xf32>
    tpu.vector_store %arg5[%c0_13, %c0_14], %24 {strides = array<i32>} : memref<1x1xf32, #tpu.memory_space<vmem>>, vector<1x1xf32>,
    %c3_i32 = arith.constant 3 : i32
    %26 = arith.cmpi eq, %arg0, %c3_i32 : i32
    %27 = arith.extui %26 : i1 to i32
    %c0_i32_15 = arith.constant 0 : i32
    %28 = arith.cmpi ne, %27, %c0_i32_15 : i32
    scf.if %28 {
      %c0_16 = arith.constant 0 : index
      %c0_17 = arith.constant 0 : index
      %29 = vector.load %arg5[%c0_16, %c0_17] : memref<1x1xf32, #tpu.memory_space<vmem>>, vector<1x1xf32>
      %c0_18 = arith.constant 0 : index
      %c0_19 = arith.constant 0 : index
      %30 = vector.load %arg4[%c0_18, %c0_19] : memref<1x1xf32, #tpu.memory_space<vmem>>, vector<1x1xf32>
      tpu.vector_store %arg4[%c0_18, %c0_19], %29 {strides = array<i32>} : memref<1x1xf32, #tpu.memory_space<vmem>>, vector<1x1xf32>,
    } else {
    }
    return
  }
  func.func @transform_0(%arg0: i32) -> (i32, i32) {
    %c0_i32 = arith.constant 0 : i32
    %c0_i32_0 = arith.constant 0 : i32
    return %arg0, %c0_i32 : i32, i32
  }
  func.func @transform_1(%arg0: i32) -> (i32, i32) {
    %c0_i32 = arith.constant 0 : i32
    %c0_i32_0 = arith.constant 0 : i32
    %c0_i32_1 = arith.constant 0 : i32
    return %c0_i32, %c0_i32_0 : i32, i32
  }
  func.func @transform_2(%arg0: i32) -> (i32, i32) {
    %c0_i32 = arith.constant 0 : i32
    %c0_i32_0 = arith.constant 0 : i32
    return %arg0, %c0_i32 : i32, i32
  }
  func.func @transform_3(%arg0: i32) -> (i32, i32) {
    %c0_i32 = arith.constant 0 : i32
    %c0_i32_0 = arith.constant 0 : i32
    %c0_i32_1 = arith.constant 0 : i32
    return %c0_i32, %c0_i32_0 : i32, i32
  }
}

</mosaic_0001>

<bundles_post_ra>
// kernel: tpu_custom_call.1
= control target key start
LH: loop header
LB: loop body
LE: loop exit
PB: predicated region body
PF: predicated region fallthrough
CT: control target
= control target key end

     0   :  { %8 = vsyncpa [#allocation5], 0  ;;  %s427_s12 = smov 0   ;;  %s475_s0 = inlined_call_operand.vmem [shape: f32[128,1], index: 0, kind: input, shape index: {}]   ;;  %s476_s1 = inlined_call_operand.vmem [shape: f32[1,128], index: 1, kind: input, shape index: {}]   ;;  %s477_s2 = inlined_call_operand.vmem [shape: f32[128,128], index: 2, kind: input, shape index: {}]   ;;  %s478_s3 = inlined_call_operand.hbm [shape: f32[1,1], index: 3, kind: output, shape index: {}]  }
   0x1 LB: > { %s433_s13 = sadd.s32 4294967295, %s402_s12   ;;  %p335_p0 = scmp.ge.s32.totalorder %s402_s12, 1  ;;  %s402_s12 = sphi %s427_s12, %s14_s12  }
   0x2   : > { %p145_p1 = scmp.lt.s32.totalorder %s402_s12, 5 }
   0x4   : > { %p146_p2 = pnand %p335_p0, %p145_p1 }
   0x5   : > { %s336_s14 = sshll.u32 (!%p146_p2), %s433_s13, 2  ;;  %p340_p4 = scmp.ne.s32.totalorder (!%p146_p2), %s433_s13, 0 }
   0x6   : > { %149 = sbr.rel (%p146_p2) target bundleno = 356 (0x164), region = 32  ;;  %p170_p3 = scmp.lt.s32.totalorder (!%p146_p2), %s336_s14, 15 }
   0xd   : > { %s480_s14 = smov (!%p170_p3, %s336_s14), 15  ;;  %184 = sbr.rel (%p340_p4) target bundleno = 20 (0x14), region = 36 }
   0xe   : > { %s337_s15 = sshll.u32 %s480_s14, 3  ;;  %vm185_vm0 = vcmask (!%p340_p4), 0   ;;  %v404_v0 = vmov (!%p340_p4), 0.0  }
   0xf   : > { %s173_s18 = scalar_lea.vmem %s475_s0, %s337_s15  ;;  %s179_s21 = scalar_lea.vmem %s477_s2, %s337_s15  ;;  %186 = vst.msk [vmem:[#allocation2] sm:$0x1] (!%p340_p4), %vm185_vm0, %v404_v0 }
  0x14 PF: > { %v194_v1 = vld [vmem:[%s173_s18 + $0x10] sm:$0xff]  ;;  %v192_v2 = vld [vmem:[%s173_s18] sm:$0xff]  ;;  %v405_v3 = vmov 0   ;;  %v195_v4 = vld [vmem:[%s173_s18 + $0x18] sm:$0xff]  ;;  %vm266_vm1 = vcmask 0   ;;  %p342_p5 = scmp.ne.s32.totalorder %s433_s13, 3 }
  0x15   : > { %365 = vset.pattern.permute.xlu1 %v405_v3  ;;  %364 = vset.pattern.permute.xlu0 %v405_v3  ;;  %v193_v5 = vld [vmem:[%s173_s18 + $0x8] sm:$0xff]  ;;  %v341_v6 = vld [vmem:[%s476_s1] ss:$0 sm:$0xff]  ;;  %v190_v8 = vld [vmem:[%s179_s21 + $0x10] sm:$0xff] }
  0x16   : > { %213 = vperm.xlu1 %365, %v194_v1   ;;  %203 = vperm.xlu0 %364, %v192_v2   ;;  %v188_v7 = vld [vmem:[%s179_s21] sm:$0xff]  ;;  %v189_v10 = vld [vmem:[%s179_s21 + $0x8] sm:$0xff]  ;;  %v237_v11 = vsub.f32 %v190_v8, %v341_v6  ;;  %v191_v17 = vld [vmem:[%s179_s21 + $0x18] sm:$0xff] }
  0x17   : > { %v235_v9 = vsub.f32 %v188_v7, %v341_v6  ;;  %v236_v18 = vsub.f32 %v189_v10, %v341_v6  ;;  %v238_v23 = vsub.f32 %v191_v17, %v341_v6  ;;  %v247_v47 = vld [vmem:[#allocation2] sm:$0x1] }
  0x18   : > { %v241_v20 = vmax.f32 %v237_v11, 0.0 }
  0x19   : > { %v239_v16 = vmax.f32 %v235_v9, 0.0  ;;  %v240_v27 = vmax.f32 %v236_v18, 0.0  ;;  %v242_v32 = vmax.f32 %v238_v23, 0.0 }
  0x1a   : > { %218 = vperm.xlu1 %365, %v195_v4   ;;  %208 = vperm.xlu0 %364, %v193_v5  }
  0x95   : > { %v214_v12 = vpop.permute.xlu1 %213  ;;  %v204_v13 = vpop.permute.xlu0 %203 }
  0x96   : > { %v223_v14 = vsub.f32 %v190_v8, %v214_v12  ;;  %v221_v15 = vsub.f32 %v188_v7, %v204_v13 }
  0x98   : > { %v227_v19 = vmax.f32 %v223_v14, 0.0  ;;  %v225_v21 = vmax.f32 %v221_v15, 0.0 }
  0x99   : > { %v219_v22 = vpop.permute.xlu1 %218  ;;  %v209_v24 = vpop.permute.xlu0 %208 }
  0x9a   : > { %v224_v25 = vsub.f32 %v191_v17, %v219_v22  ;;  %v222_v26 = vsub.f32 %v189_v10, %v209_v24  ;;  %v243_v28 = vadd.f32 %v239_v16, %v225_v21  ;;  %v245_v30 = vadd.f32 %v241_v20, %v227_v19 }
  0x9c   : > { %v226_v29 = vmax.f32 %v222_v26, 0.0  ;;  %248 = vadd.xlane.f32.xlu0 %v243_v28  ;;  %v228_v31 = vmax.f32 %v224_v25, 0.0 }
  0x9e   : > { %v244_v33 = vadd.f32 %v240_v27, %v226_v29  ;;  %v246_v34 = vadd.f32 %v242_v32, %v228_v31 }
  0xa0   : > { %250 = vadd.xlane.f32.xlu1 %v244_v33  ;;  %252 = vadd.xlane.f32.xlu0 %v245_v30 }
  0xa4   : > { %254 = vadd.xlane.f32.xlu0 %v246_v34 }
 0x129   : > { %v249_v35 = vpop.xlane.xlu0 %248 }
 0x12d   : > { %v251_v36 = vpop.xlane.xlu1 %250  ;;  %v253_v37 = vpop.xlane.xlu0 %252 }
 0x12e   : > { %v256_v38 = vadd.f32 %v251_v36, %v249_v35 }
 0x130   : > { %v257_v39 = vadd.f32 %v256_v38, %v253_v37 }
 0x131   : > { %v255_v40 = vpop.xlane.xlu0 %254 }
 0x132   : > { %v258_v41 = vadd.f32 %v257_v39, %v255_v40 }
 0x134   : > { %v259_v42 = vrot.slane %v258_v41, 4 }
 0x136   : > { %v260_v43 = vadd.f32 %v259_v42, %v258_v41 }
 0x138   : > { %v261_v44 = vrot.slane %v260_v43, 2 }
 0x13a   : > { %v262_v45 = vadd.f32 %v261_v44, %v260_v43 }
 0x13c   : > { %v263_v46 = vrot.slane %v262_v45, 1  ;;  %271 = sbr.rel (%p342_p5) target bundleno = 331 (0x14b), region = 40 }
 0x13e   : > { %v264_v48 = vadd.f32 %v263_v46, %v262_v45 }
 0x140   : > { %v265_v49 = vadd.f32 %v264_v48, %v247_v47 }
 0x142   : > { %267 = vst.msk [vmem:[#allocation2] sm:$0x1] %vm266_vm1, %v265_v49 }
 0x149   : > { %v272_v50 = vld [vmem:[#allocation2] sm:$0x1] }
 0x14a   : > { %273 = vst.msk [vmem:[#allocation4] sm:$0x1] %vm266_vm1, %v272_v50 }
 0x14b PF: > { %p351_p6 = scmp.eq.s32.totalorder %s433_s13, 3  ;;  %s406_s24 = smov [#allocation4]  }
 0x14c   : > { %s281_s25 = sshll.u32 %s406_s24, 4  ;;  %s282_s25 = int_to_ptr.vmem [resolvable:$true] %s281_s25 }
 0x14d   : > { %s366_s26 = scalar_lea.vmem %s282_s25, 16  ;;  %s372_s27 = scalar_lea.vmem %s282_s25, 32 }
 0x14e   : > { %p367_p7 = scmp.ne.s32.totalorder %s282_s25, %s366_s26  ;;  %p373_p10 = scmp.lt.s32.totalorder %s282_s25, %s282_s25 }
 0x14f   : > { %p374_p11 = scmp.lt.s32.totalorder %s372_s27, %s366_s26 }
 0x150   : > { %p368_p8 = pnand %p367_p7, %p351_p6 }
 0x151   : > { %p375_p12 = por %p374_p11, %p373_p10 }
 0x152   : > { %p369_p9 = pneg %p368_p8 }
 0x154   : > { %p376_p13 = pnand %p375_p12, %p369_p9 }
 0x156   : > { %379 = shalt.err (!%p376_p13)
}
 0x157   : > { %s380_s30 = scalar_lea.hbm %s478_s3, 16 }
 0x158   : > { %p381_p0 = scmp.ne.s32.totalorder %s478_s3, %s380_s30  ;;  %p386_p3 = scmp.lt.u32.totalorder %s380_s30, %s478_s3 }
 0x15a   : > { %p382_p1 = pnand %p381_p0, %p351_p6 }
 0x15c   : > { %p383_p2 = pneg %p382_p1 }
 0x15e   : > { %p388_p4 = pnand %p386_p3, %p383_p2 }
 0x160   : > { %391 = shalt.err (!%p388_p4)
}
 0x161   : > { %348 = dma.vmem_to_hbm [thread:$0]  (%p351_p6), %s282_s25, 16, %s478_s3, [#allocation5]  }
 0x162   : > { %397 = dma.done.wait (%p351_p6), [#allocation5], 16  }
 0x163   : > { %399 = vsyncadd (%p351_p6), [#allocation5], 4294967280 }
 0x164 PF: > { %s14_s12 = sadd.s32 1, %s402_s12  }
 0x165   : > { %p11_p5 = scmp.ge.s32.totalorder %s14_s12, 6  }
 0x167   :  { %13 = sbr.rel (!%p11_p5) target bundleno = 1 (0x1), region = 70 }
 0x16e   :  { %294 = vsyncpa [#allocation5], 1 }
 0x16f   :  { %296 = vsyncpa [#allocation5 + $0x1], 1 }

</bundles_post_ra>
